<compile_context>
chip_gen: v6e
topology: v6e:2x2x1
jax: 0.10.0
libtpu: 0.0.40
codegen_flags: <defaults>
</compile_context>

<pallas_src>
import jax
import jax.numpy as jnp
from jax.experimental import pallas as pl
from jax.experimental.pallas import tpu as pltpu


def _round_up(x, m):
    return (x + m - 1) // m * m


def _tpu_caps():
    """Return (vmem_capacity_bytes, num_tensorcores) with safe fallbacks."""
    vmem_cap = 64 << 20      # conservative default = v7x per-TC capacity
    num_tc = 1
    try:
        info = pltpu.get_tpu_info()
        cap = getattr(info, "vmem_capacity_bytes", None)
        if isinstance(cap, int) and cap > 0:
            vmem_cap = cap
        for attr in ("num_cores", "tensorcore_count", "num_tensorcores"):
            v = getattr(info, attr, None)
            if isinstance(v, int) and v > 0:
                num_tc = v
                break
    except Exception:
        pass
    try:
        if "v7" in jax.devices()[0].device_kind.lower():
            num_tc = max(num_tc, 2)      # v7x: 2 TensorCores per chip
    except Exception:
        pass
    return vmem_cap, min(max(num_tc, 1), 2)


def _choose_batch_tile(B, num_tc, max_tb=256):
    """Largest batch tile with low padding waste; split only for 2-TC chips."""
    Bp = _round_up(max(B, 1), 8)
    if num_tc >= 2 and Bp >= 16:
        # Keep >= num_tc grid steps so megacore can shard the batch axis.
        cap = min(max_tb, _round_up(pl.cdiv(Bp, num_tc), 8))
    else:
        # 1 TC: the grid is a serial loop -> prefer a single, largest tile.
        cap = min(max_tb, Bp)
    tb = 8
    for cand in [cap] + [c for c in (256, 128, 64, 32, 16, 8) if c <= cap]:
        waste = _round_up(Bp, cand) - Bp
        if waste <= max(Bp // 8, 0):          # <= ~12.5% padded-row waste
            tb = cand
            break
    return tb, _round_up(Bp, tb)


def _choose_n_tile(Hp, Dp, vmem_cap):
    """Output-feature tile: keep W2 resident if it fits, else lane-dense tiles."""
    budget = max(vmem_cap // 4, 2 << 20)
    if Hp * Dp * 2 <= budget:                 # whole bf16 W2 fits comfortably
        return Dp
    m = Dp // 128
    for d in range(m, 0, -1):                 # largest 128-multiple divisor of Dp
        if m % d == 0 and 2 * Hp * (128 * d) * 2 <= budget:
            return 128 * d
    return 128


def _generator_kernel(noise_ref, w1_ref, b1_ref, w2_ref, b2_ref, out_ref, h_ref):
    # Layer 1 (Linear + ReLU) only when the batch tile changes (j == 0); the
    # f32 activations are cached in VMEM scratch and reused for every N tile.
    @pl.when(pl.program_id(1) == 0)
    def _():
        x = noise_ref[...].astype(w1_ref.dtype)           # bf16 cast on the VPU
        h = jnp.dot(x, w1_ref[...], preferred_element_type=jnp.float32)
        h_ref[...] = jnp.maximum(h + b1_ref[...], 0.0)

    # Layer 2 (Linear + Tanh) for this (batch, N) tile: MXU + VPU + EUP.
    o = jnp.dot(h_ref[...].astype(w2_ref.dtype), w2_ref[...],
                preferred_element_type=jnp.float32)
    out_ref[...] = jnp.tanh(o + b2_ref[...]).astype(out_ref.dtype)


def prepare_generator_params(w1, b1, w2, b2):
    """Pad + bf16-cast the generator weights ONCE (cache and reuse per call).

    w1: (Z, H), b1: (H,)/(1,H), w2: (H, D), b2: (D,)/(1,D).
    """
    Z, H = w1.shape
    H2, D = w2.shape
    assert H == H2, "w1/w2 hidden dims must match"

    Zp = _round_up(Z, 16)        # contraction dim: bf16 sublane-pack alignment
    Hp = _round_up(H, 128)       # lane-dense hidden dim
    Dp = _round_up(D, 128)       # lane-dense output dim

    f32, bf16 = jnp.float32, jnp.bfloat16
    # Zero padding is exact under ReLU/Tanh (padded rows/cols contribute 0 and
    # any padded output rows/cols are sliced off in the wrapper).
    w1_p = jnp.zeros((Zp, Hp), f32).at[:Z, :H].set(w1.astype(f32)).astype(bf16)
    w2_p = jnp.zeros((Hp, Dp), f32).at[:H, :D].set(w2.astype(f32)).astype(bf16)
    b1_p = jnp.zeros((1, Hp), f32).at[:, :H].set(jnp.reshape(b1, (1, H)).astype(f32))
    b2_p = jnp.zeros((1, Dp), f32).at[:, :D].set(jnp.reshape(b2, (1, D)).astype(f32))
    return {"w1": w1_p, "b1": b1_p, "w2": w2_p, "b2": b2_p, "z": Z, "d": D}


def generator_forward(noise, params, *, max_tb=256, out_dtype=jnp.float32):
    """Fused 2-layer MLP generator forward. noise: (B, Z) float. Returns (B, D)."""
    w1, b1, w2, b2 = params["w1"], params["b1"], params["w2"], params["b2"]
    Z, D = params["z"], params["d"]
    B, Zn = noise.shape
    assert Zn == Z, "noise latent dim must match the prepared weights"

    Zp, Hp = w1.shape
    _, Dp = w2.shape

    vmem_cap, num_tc = _tpu_caps()
    tb, Bp = _choose_batch_tile(B, num_tc, max_tb)
    tn = _choose_n_tile(Hp, Dp, vmem_cap)
    nb, nn = Bp // tb, Dp // tn

    # Pad the activations only when actually needed (f32 straight into the
    # kernel; the bf16 cast happens in-kernel next to the MXU).
    if Bp != B or Zp != Z:
        noise_in = jnp.zeros((Bp, Zp), noise.dtype).at[:B, :Z].set(noise)
    else:
        noise_in = noise

    w1_map = lambda i, j: (0, 0)
    b1_map = lambda i, j: (0, 0)
    w2_map = (lambda i, j: (0, 0)) if nn == 1 else (lambda i, j: (0, j))
    b2_map = w2_map

    def run(single_buffer_weights):
        inv_mode = pl.Buffered(1) if single_buffer_weights else None
        w2_mode = inv_mode if nn == 1 else None
        wbuf1 = 1 if single_buffer_weights else 2
        wbuf2 = 1 if (single_buffer_weights and nn == 1) else 2
        out_size = jnp.finfo(out_dtype).bits // 8
        in_size = noise_in.dtype.itemsize

        # VMEM budget: pipelined tiles + (single/double-buffered) weights +
        # h scratch + in-kernel intermediates (bf16 casts, f32 accumulator).
        vmem_bytes = (
            2 * tb * Zp * in_size            # noise tiles (double-buffered)
            + 2 * tb * tn * out_size         # output tiles (double-buffered)
            + wbuf1 * (Zp * Hp * 2 + Hp * 4) # W1 (bf16) + b1 (f32)
            + wbuf2 * (Hp * tn * 2 + tn * 4) # W2 tile (bf16) + b2 tile (f32)
            + tb * Hp * 4                    # h scratch (f32)
            + tb * (Zp + Hp) * 2             # bf16 casts of x and h
            + tb * tn * 4                    # layer-2 f32 accumulator
            + (4 << 20)                      # headroom
        )
        vmem_bytes = int(min(max(vmem_bytes, 16 << 20), int(0.875 * vmem_cap)))

        return pl.pallas_call(
            _generator_kernel,
            out_shape=jax.ShapeDtypeStruct((Bp, Dp), out_dtype),
            grid_spec=pltpu.PrefetchScalarGridSpec(
                num_scalar_prefetch=0,
                grid=(nb, nn),
                in_specs=[
                    pl.BlockSpec((tb, Zp), lambda i, j: (i, 0)),          # noise
                    pl.BlockSpec((Zp, Hp), w1_map, pipeline_mode=inv_mode),  # W1
                    pl.BlockSpec((1, Hp), b1_map, pipeline_mode=inv_mode),   # b1
                    pl.BlockSpec((Hp, tn), w2_map, pipeline_mode=w2_mode),   # W2
                    pl.BlockSpec((1, tn), b2_map, pipeline_mode=w2_mode),    # b2
                ],
                out_specs=pl.BlockSpec((tb, tn), lambda i, j: (i, j)),
                scratch_shapes=[pltpu.VMEM((tb, Hp), jnp.float32)],       # h cache
            ),
            compiler_params=pltpu.CompilerParams(
                dimension_semantics=("parallel", "arbitrary"),
                vmem_limit_bytes=vmem_bytes,
            ),
        )(noise_in, w1, b1, w2, b2)

    try:
        out_p = run(single_buffer_weights=True)
    except Exception:
        # Fallback for JAX versions without BlockSpec pipeline_mode support.
        out_p = run(single_buffer_weights=False)

    # Skip the extra HBM pass when no padding was applied.
    if Bp == B and Dp == D:
        return out_p
    return out_p[:B, :D]


if __name__ == "__main__":
    # Small shapes consistent with a GAN generator forward on noise.
    B, Z, H, D = 8, 32, 64, 128

    key = jax.random.PRNGKey(0)
    k_noise, k_w1, k_b1, k_w2, k_b2 = jax.random.split(key, 5)

    noise = jax.random.normal(k_noise, (B, Z), dtype=jnp.float32)

    # Deterministic parameter init (uniform like nn.Linear default, fixed key).
    def lin_init(kw, kb, fan_in, fan_out):
        bound = 1.0 / jnp.sqrt(jnp.float32(fan_in))
        w = jax.random.uniform(kw, (fan_in, fan_out), jnp.float32, -bound, bound)
        b = jax.random.uniform(kb, (1, fan_out), jnp.float32, -bound, bound)
        return w, b

    w1, b1 = lin_init(k_w1, k_b1, Z, H)
    w2, b2 = lin_init(k_w2, k_b2, H, D)

    # Weights are padded / bf16-cast exactly once, then reused per forward.
    params = prepare_generator_params(w1, b1, w2, b2)
    out = generator_forward(noise, params)
    out = jax.block_until_ready(out)

    # Reference in plain JAX with the same bf16 matmul / f32 accumulation recipe.
    bf16 = jnp.bfloat16
    h_ref = jnp.maximum(
        jnp.dot(noise.astype(bf16), w1.astype(bf16),
                preferred_element_type=jnp.float32) + b1, 0.0)
    ref = jnp.tanh(
        jnp.dot(h_ref.astype(bf16), w2.astype(bf16),
                preferred_element_type=jnp.float32) + b2)

    assert out.shape == (B, D)
    err = jnp.max(jnp.abs(out - ref))
    assert jnp.allclose(out, ref, atol=1e-2, rtol=1e-2), f"max abs err {err}"

    print("KERNEL_OK")
</pallas_src>

<mosaic_0001>
module attributes {stable_mosaic.version = 11 : i64} {
  func.func @_generator_kernel(%arg0: i32, %arg1: i32, %arg2: memref<8x32xf32, #tpu.memory_space<vmem>>, %arg3: memref<32x128xbf16, #tpu.memory_space<vmem>>, %arg4: memref<1x128xf32, #tpu.memory_space<vmem>>, %arg5: memref<128x128xbf16, #tpu.memory_space<vmem>>, %arg6: memref<1x128xf32, #tpu.memory_space<vmem>>, %arg7: memref<8x128xf32, #tpu.memory_space<vmem>>, %arg8: memref<8x128xf32, #tpu.memory_space<vmem>>) attributes {dimension_semantics = [#tpu.dimension_semantics<parallel>, #tpu.dimension_semantics<arbitrary>], iteration_bounds = array<i64: 1, 1>, scalar_prefetch = 0 : i64, scratch_operands = 1 : i64, tpu.core_type = #tpu.core_type<tc>, window_params = [{transform_indices = @transform_0, window_bounds = array<i64: 8, 32>}, {pipeline_mode = #tpu.pipeline_mode<synchronous>, transform_indices = @transform_1, window_bounds = array<i64: 32, 128>}, {pipeline_mode = #tpu.pipeline_mode<synchronous>, transform_indices = @transform_2, window_bounds = array<i64: 1, 128>}, {pipeline_mode = #tpu.pipeline_mode<synchronous>, transform_indices = @transform_3, window_bounds = array<i64: 128, 128>}, {pipeline_mode = #tpu.pipeline_mode<synchronous>, transform_indices = @transform_4, window_bounds = array<i64: 1, 128>}, {transform_indices = @transform_5, window_bounds = array<i64: 8, 128>}]} {
    %c0_i32 = arith.constant 0 : i32
    %0 = arith.cmpi eq, %arg1, %c0_i32 : i32
    %1 = arith.extui %0 : i1 to i32
    %c0_i32_0 = arith.constant 0 : i32
    %2 = arith.cmpi ne, %1, %c0_i32_0 : i32
    scf.if %2 {
      %c0_8 = arith.constant 0 : index
      %c0_9 = arith.constant 0 : index
      %12 = vector.load %arg2[%c0_8, %c0_9] : memref<8x32xf32, #tpu.memory_space<vmem>>, vector<8x32xf32>
      %13 = arith.truncf %12 : vector<8x32xf32> to vector<8x32xbf16>
      %c0_10 = arith.constant 0 : index
      %c0_11 = arith.constant 0 : index
      %14 = vector.load %arg3[%c0_10, %c0_11] : memref<32x128xbf16, #tpu.memory_space<vmem>>, vector<32x128xbf16>
      %cst_12 = arith.constant dense<0.000000e+00> : vector<8x128xf32>
      %15 = tpu.matmul %13, %14, %cst_12 {dimension_numbers = #tpu.dot_dimension_numbers<[1], [0], [0], [1], [0, 0, 1, 1], [], []>} : vector<8x32xbf16>, vector<32x128xbf16>, vector<8x128xf32> -> vector<8x128xf32>
      %c0_13 = arith.constant 0 : index
      %c0_14 = arith.constant 0 : index
      %16 = vector.load %arg4[%c0_13, %c0_14] : memref<1x128xf32, #tpu.memory_space<vmem>>, vector<1x128xf32>
      %17 = vector.broadcast %16 : vector<1x128xf32> to vector<8x128xf32>
      %18 = arith.addf %15, %17 : vector<8x128xf32>
      %cst_15 = arith.constant 0.000000e+00 : f32
      %19 = vector.broadcast %cst_15 : f32 to vector<8x128xf32>
      %20 = arith.maximumf %18, %19 : vector<8x128xf32>
      %c0_16 = arith.constant 0 : index
      %c0_17 = arith.constant 0 : index
      %21 = vector.load %arg8[%c0_16, %c0_17] : memref<8x128xf32, #tpu.memory_space<vmem>>, vector<8x128xf32>
      tpu.vector_store %arg8[%c0_16, %c0_17], %20 {strides = array<i32>} : memref<8x128xf32, #tpu.memory_space<vmem>>, vector<8x128xf32>,
    } else {
    }
    %c0 = arith.constant 0 : index
    %c0_1 = arith.constant 0 : index
    %3 = vector.load %arg8[%c0, %c0_1] : memref<8x128xf32, #tpu.memory_space<vmem>>, vector<8x128xf32>
    %4 = arith.truncf %3 : vector<8x128xf32> to vector<8x128xbf16>
    %c0_2 = arith.constant 0 : index
    %c0_3 = arith.constant 0 : index
    %5 = vector.load %arg5[%c0_2, %c0_3] : memref<128x128xbf16, #tpu.memory_space<vmem>>, vector<128x128xbf16>
    %cst = arith.constant dense<0.000000e+00> : vector<8x128xf32>
    %6 = tpu.matmul %4, %5, %cst {dimension_numbers = #tpu.dot_dimension_numbers<[1], [0], [0], [1], [0, 0, 1, 1], [], []>} : vector<8x128xbf16>, vector<128x128xbf16>, vector<8x128xf32> -> vector<8x128xf32>
    %c0_4 = arith.constant 0 : index
    %c0_5 = arith.constant 0 : index
    %7 = vector.load %arg6[%c0_4, %c0_5] : memref<1x128xf32, #tpu.memory_space<vmem>>, vector<1x128xf32>
    %8 = vector.broadcast %7 : vector<1x128xf32> to vector<8x128xf32>
    %9 = arith.addf %6, %8 : vector<8x128xf32>
    %10 = math.tanh %9 : vector<8x128xf32>
    %c0_6 = arith.constant 0 : index
    %c0_7 = arith.constant 0 : index
    %11 = vector.load %arg7[%c0_6, %c0_7] : memref<8x128xf32, #tpu.memory_space<vmem>>, vector<8x128xf32>
    tpu.vector_store %arg7[%c0_6, %c0_7], %10 {strides = array<i32>} : memref<8x128xf32, #tpu.memory_space<vmem>>, vector<8x128xf32>,
    return
  }
  func.func @transform_0(%arg0: i32, %arg1: i32) -> (i32, i32) {
    %c0_i32 = arith.constant 0 : i32
    %c0_i32_0 = arith.constant 0 : i32
    return %arg0, %c0_i32 : i32, i32
  }
  func.func @transform_1(%arg0: i32, %arg1: i32) -> (i32, i32) {
    %c0_i32 = arith.constant 0 : i32
    %c0_i32_0 = arith.constant 0 : i32
    %c0_i32_1 = arith.constant 0 : i32
    return %c0_i32, %c0_i32_0 : i32, i32
  }
  func.func @transform_2(%arg0: i32, %arg1: i32) -> (i32, i32) {
    %c0_i32 = arith.constant 0 : i32
    %c0_i32_0 = arith.constant 0 : i32
    %c0_i32_1 = arith.constant 0 : i32
    return %c0_i32, %c0_i32_0 : i32, i32
  }
  func.func @transform_3(%arg0: i32, %arg1: i32) -> (i32, i32) {
    %c0_i32 = arith.constant 0 : i32
    %c0_i32_0 = arith.constant 0 : i32
    %c0_i32_1 = arith.constant 0 : i32
    return %c0_i32, %c0_i32_0 : i32, i32
  }
  func.func @transform_4(%arg0: i32, %arg1: i32) -> (i32, i32) {
    %c0_i32 = arith.constant 0 : i32
    %c0_i32_0 = arith.constant 0 : i32
    %c0_i32_1 = arith.constant 0 : i32
    return %c0_i32, %c0_i32_0 : i32, i32
  }
  func.func @transform_5(%arg0: i32, %arg1: i32) -> (i32, i32) {
    %c0_i32 = arith.constant 0 : i32
    return %arg0, %arg1 : i32, i32
  }
}

module attributes {stable_mosaic.version = 11 : i64} {
  func.func @_generator_kernel(%arg0: i32, %arg1: i32, %arg2: memref<8x32xf32, #tpu.memory_space<vmem>>, %arg3: memref<32x128xbf16, #tpu.memory_space<vmem>>, %arg4: memref<1x128xf32, #tpu.memory_space<vmem>>, %arg5: memref<128x128xbf16, #tpu.memory_space<vmem>>, %arg6: memref<1x128xf32, #tpu.memory_space<vmem>>, %arg7: memref<8x128xf32, #tpu.memory_space<vmem>>, %arg8: memref<8x128xf32, #tpu.memory_space<vmem>>) attributes {dimension_semantics = [#tpu.dimension_semantics<parallel>, #tpu.dimension_semantics<arbitrary>], iteration_bounds = array<i64: 1, 1>, scalar_prefetch = 0 : i64, scratch_operands = 1 : i64, tpu.core_type = #tpu.core_type<tc>, window_params = [{transform_indices = @transform_0, window_bounds = array<i64: 8, 32>}, {pipeline_mode = #tpu.pipeline_mode<synchronous>, transform_indices = @transform_1, window_bounds = array<i64: 32, 128>}, {pipeline_mode = #tpu.pipeline_mode<synchronous>, transform_indices = @transform_2, window_bounds = array<i64: 1, 128>}, {pipeline_mode = #tpu.pipeline_mode<synchronous>, transform_indices = @transform_3, window_bounds = array<i64: 128, 128>}, {pipeline_mode = #tpu.pipeline_mode<synchronous>, transform_indices = @transform_4, window_bounds = array<i64: 1, 128>}, {transform_indices = @transform_5, window_bounds = array<i64: 8, 128>}]} {
    %c0_i32 = arith.constant 0 : i32
    %0 = arith.cmpi eq, %arg1, %c0_i32 : i32
    %1 = arith.extui %0 : i1 to i32
    %c0_i32_0 = arith.constant 0 : i32
    %2 = arith.cmpi ne, %1, %c0_i32_0 : i32
    scf.if %2 {
      %c0_8 = arith.constant 0 : index
      %c0_9 = arith.constant 0 : index
      %12 = vector.load %arg2[%c0_8, %c0_9] : memref<8x32xf32, #tpu.memory_space<vmem>>, vector<8x32xf32>
      %13 = arith.truncf %12 : vector<8x32xf32> to vector<8x32xbf16>
      %c0_10 = arith.constant 0 : index
      %c0_11 = arith.constant 0 : index
      %14 = vector.load %arg3[%c0_10, %c0_11] : memref<32x128xbf16, #tpu.memory_space<vmem>>, vector<32x128xbf16>
      %cst_12 = arith.constant dense<0.000000e+00> : vector<8x128xf32>
      %15 = tpu.matmul %13, %14, %cst_12 {dimension_numbers = #tpu.dot_dimension_numbers<[1], [0], [0], [1], [0, 0, 1, 1], [], []>} : vector<8x32xbf16>, vector<32x128xbf16>, vector<8x128xf32> -> vector<8x128xf32>
      %c0_13 = arith.constant 0 : index
      %c0_14 = arith.constant 0 : index
      %16 = vector.load %arg4[%c0_13, %c0_14] : memref<1x128xf32, #tpu.memory_space<vmem>>, vector<1x128xf32>
      %17 = vector.broadcast %16 : vector<1x128xf32> to vector<8x128xf32>
      %18 = arith.addf %15, %17 : vector<8x128xf32>
      %cst_15 = arith.constant 0.000000e+00 : f32
      %19 = vector.broadcast %cst_15 : f32 to vector<8x128xf32>
      %20 = arith.maximumf %18, %19 : vector<8x128xf32>
      %c0_16 = arith.constant 0 : index
      %c0_17 = arith.constant 0 : index
      %21 = vector.load %arg8[%c0_16, %c0_17] : memref<8x128xf32, #tpu.memory_space<vmem>>, vector<8x128xf32>
      tpu.vector_store %arg8[%c0_16, %c0_17], %20 {strides = array<i32>} : memref<8x128xf32, #tpu.memory_space<vmem>>, vector<8x128xf32>,
    } else {
    }
    %c0 = arith.constant 0 : index
    %c0_1 = arith.constant 0 : index
    %3 = vector.load %arg8[%c0, %c0_1] : memref<8x128xf32, #tpu.memory_space<vmem>>, vector<8x128xf32>
    %4 = arith.truncf %3 : vector<8x128xf32> to vector<8x128xbf16>
    %c0_2 = arith.constant 0 : index
    %c0_3 = arith.constant 0 : index
    %5 = vector.load %arg5[%c0_2, %c0_3] : memref<128x128xbf16, #tpu.memory_space<vmem>>, vector<128x128xbf16>
    %cst = arith.constant dense<0.000000e+00> : vector<8x128xf32>
    %6 = tpu.matmul %4, %5, %cst {dimension_numbers = #tpu.dot_dimension_numbers<[1], [0], [0], [1], [0, 0, 1, 1], [], []>} : vector<8x128xbf16>, vector<128x128xbf16>, vector<8x128xf32> -> vector<8x128xf32>
    %c0_4 = arith.constant 0 : index
    %c0_5 = arith.constant 0 : index
    %7 = vector.load %arg6[%c0_4, %c0_5] : memref<1x128xf32, #tpu.memory_space<vmem>>, vector<1x128xf32>
    %8 = vector.broadcast %7 : vector<1x128xf32> to vector<8x128xf32>
    %9 = arith.addf %6, %8 : vector<8x128xf32>
    %10 = math.tanh %9 : vector<8x128xf32>
    %c0_6 = arith.constant 0 : index
    %c0_7 = arith.constant 0 : index
    %11 = vector.load %arg7[%c0_6, %c0_7] : memref<8x128xf32, #tpu.memory_space<vmem>>, vector<8x128xf32>
    tpu.vector_store %arg7[%c0_6, %c0_7], %10 {strides = array<i32>} : memref<8x128xf32, #tpu.memory_space<vmem>>, vector<8x128xf32>,
    return
  }
  func.func @transform_0(%arg0: i32, %arg1: i32) -> (i32, i32) {
    %c0_i32 = arith.constant 0 : i32
    %c0_i32_0 = arith.constant 0 : i32
    return %arg0, %c0_i32 : i32, i32
  }
  func.func @transform_1(%arg0: i32, %arg1: i32) -> (i32, i32) {
    %c0_i32 = arith.constant 0 : i32
    %c0_i32_0 = arith.constant 0 : i32
    %c0_i32_1 = arith.constant 0 : i32
    return %c0_i32, %c0_i32_0 : i32, i32
  }
  func.func @transform_2(%arg0: i32, %arg1: i32) -> (i32, i32) {
    %c0_i32 = arith.constant 0 : i32
    %c0_i32_0 = arith.constant 0 : i32
    %c0_i32_1 = arith.constant 0 : i32
    return %c0_i32, %c0_i32_0 : i32, i32
  }
  func.func @transform_3(%arg0: i32, %arg1: i32) -> (i32, i32) {
    %c0_i32 = arith.constant 0 : i32
    %c0_i32_0 = arith.constant 0 : i32
    %c0_i32_1 = arith.constant 0 : i32
    return %c0_i32, %c0_i32_0 : i32, i32
  }
  func.func @transform_4(%arg0: i32, %arg1: i32) -> (i32, i32) {
    %c0_i32 = arith.constant 0 : i32
    %c0_i32_0 = arith.constant 0 : i32
    %c0_i32_1 = arith.constant 0 : i32
    return %c0_i32, %c0_i32_0 : i32, i32
  }
  func.func @transform_5(%arg0: i32, %arg1: i32) -> (i32, i32) {
    %c0_i32 = arith.constant 0 : i32
    return %arg0, %arg1 : i32, i32
  }
}

</mosaic_0001>

<bundles_post_ra>
// kernel: tpu_custom_call.1
= control target key start
LH: loop header
LB: loop body
LE: loop exit
PB: predicated region body
PF: predicated region fallthrough
CT: control target
= control target key end

     0   :  { %10 = vsyncpa [#allocation4], 0  ;;  %s482_s0 = inlined_call_operand.hbm [shape: f32[8,32], index: 0, kind: input, shape index: {}]   ;;  %s483_s1 = inlined_call_operand.hbm [shape: bf16[32,128], index: 1, kind: input, shape index: {}]   ;;  %s484_s2 = inlined_call_operand.vmem [shape: f32[1,128], index: 2, kind: input, shape index: {}]   ;;  %s485_s3 = inlined_call_operand.hbm [shape: bf16[128,128], index: 3, kind: input, shape index: {}]   ;;  %s486_s4 = inlined_call_operand.vmem [shape: f32[1,128], index: 4, kind: input, shape index: {}]   ;;  %s487_s5 = inlined_call_operand.hbm [shape: f32[8,128], index: 5, kind: output, shape index: {}]  }
   0x1   :  { %11 = vsyncpa [#allocation7], 0 }
   0x2   :  { %12 = vsyncpa [#allocation5], 0  ;;  %s426_s18 = smov [#allocation6]  }
   0x3   :  { %s28_s19 = sshll.u32 %s426_s18, 4  ;;  %s29_s19 = int_to_ptr.vmem [resolvable:$true] %s28_s19 }
   0x4   :  { %s348_s20 = scalar_lea.vmem %s29_s19, 256  ;;  %p353_p1 = scmp.lt.s32.totalorder %s29_s19, %s29_s19 }
   0x5   :  { %p349_p0 = scmp.ne.s32.totalorder %s29_s19, %s348_s20  ;;  %p354_p2 = scmp.lt.s32.totalorder %s348_s20, %s348_s20 }
   0x7   :  { %p355_p3 = por %p354_p2, %p353_p1 }
   0x9   :  { %p356_p4 = pnand %p355_p3, %p349_p0 }
   0xb   :  { %359 = shalt.err (!%p356_p4)
}
   0xc   :  { %s427_s21 = smov 64   ;;  %s428_s22 = smov 4  }
   0xd   :  { %34 = dma.hbm_to_vmem [thread:$0]  %s483_s1, 256, %s29_s19, [#allocation7], %s427_s21, %s427_s21, %s428_s22  }
   0xe   :  { %s429_s25 = smov [#allocation3]   ;;  %s430_s27 = smov [#allocation8]  }
   0xf   :  { %s19_s26 = sshll.u32 %s429_s25, 4  ;;  %s42_s28 = sshll.u32 %s430_s27, 4  ;;  %s20_s26 = int_to_ptr.vmem [resolvable:$true] %s19_s26  ;;  %s43_s28 = int_to_ptr.vmem [resolvable:$true] %s42_s28 }
  0x10   :  { %s368_s29 = scalar_lea.vmem %s20_s26, 128  ;;  %p373_p6 = scmp.lt.s32.totalorder %s20_s26, %s20_s26 }
  0x11   :  { %p369_p5 = scmp.ne.s32.totalorder %s20_s26, %s368_s29  ;;  %p374_p7 = scmp.lt.s32.totalorder %s368_s29, %s368_s29 }
  0x13   :  { %p375_p8 = por %p374_p7, %p373_p6 }
  0x15   :  { %p376_p9 = pnand %p375_p8, %p369_p5 }
  0x17   :  { %379 = shalt.err (!%p376_p9)
}
  0x18   :  { %22 = dma.hbm_to_vmem [thread:$0]  %s482_s0, 128, %s20_s26, [#allocation4]  }
  0x19   :  { %s388_s7 = scalar_lea.vmem %s43_s28, 1024  ;;  %p393_p11 = scmp.lt.s32.totalorder %s43_s28, %s43_s28 }
  0x1a   :  { %p389_p10 = scmp.ne.s32.totalorder %s43_s28, %s388_s7  ;;  %p394_p12 = scmp.lt.s32.totalorder %s388_s7, %s388_s7 }
  0x1c   :  { %p395_p13 = por %p394_p12, %p393_p11 }
  0x1e   :  { %p396_p0 = pnand %p395_p13, %p389_p10 }
  0x20   :  { %399 = shalt.err (!%p396_p0)
}
  0x21   :  { %48 = dma.hbm_to_vmem [thread:$0]  %s485_s3, 1024, %s43_s28, [#allocation7], %s427_s21, %s427_s21, %s428_s22  }
  0x22   :  { %420 = dma.done.wait [#allocation4], 128  }
  0x23   :  { %421 = vsyncadd [#allocation4], 4294967168 }
  0x24   :  { %422 = dma.done.wait [#allocation7], 1280  }
  0x25   :  { %423 = vsyncadd [#allocation7], 4294966016  ;;  %v431_v0 = vmov 0.0   ;;  %vm432_vm0 = vmmov 0   ;;  %v328_v1 = vld [vmem:[#allocation6 + $0x8] sm:$0xff]   ;;  %v329_v2 = vld [vmem:[#allocation6] sm:$0xff]  }
  0x26   :  { %292 = vmatprep.subr.bf16.mxu0 %v431_v0  ;;  %296 = vmatprep.mubr.msk.bf16.mxu0 %vm432_vm0, %v431_v0  ;;  %v65_v3 = vld [vmem:[#allocation3] sm:$0xff]  ;;  %v330_v4 = vld [vmem:[#allocation8 + $0x38] sm:$0xff]   ;;  %v331_v6 = vld [vmem:[#allocation8 + $0x30] sm:$0xff]   ;;  %vm90_vm1 = vcmask 261120   ;;  %s433_s11 = smov [#allocation9]  }
  0x27   :  { %300 = vmatprep.subr.bf16.mxu1 %v431_v0  ;;  %316 = vmatprep.mubr.msk.bf16.mxu1 %vm432_vm0, %v431_v0  ;;  %v66_v5 = vpack.c.bf16 %v65_v3, %v65_v3  ;;  %v332_v7 = vld [vmem:[#allocation8 + $0x28] sm:$0xff]   ;;  %v333_v8 = vld [vmem:[#allocation8 + $0x20] sm:$0xff]   ;;  %v334_v9 = vld [vmem:[#allocation8 + $0x18] sm:$0xff]  }
  0x28   :  { %293 = vmatpush3.bf16.msra.mxu0 %v328_v1  ;;  %301 = vmatpush3.bf16.msra.mxu1 %v330_v4  ;;  %v335_v10 = vld [vmem:[#allocation8 + $0x10] sm:$0xff]   ;;  %v336_v11 = vld [vmem:[#allocation8 + $0x8] sm:$0xff]   ;;  %v337_v12 = vld [vmem:[#allocation8] sm:$0xff]  }
  0x29   :  { %294 = vmatprep.subr.bf16.mxu0 %v431_v0  ;;  %302 = vmatprep.subr.bf16.mxu1 %v431_v0  ;;  %v267_v13 = vld [vmem:[%s484_s2] ss:$0 sm:$0xff]  ;;  %s257_s2 = sshll.u32 %s433_s11, 4  ;;  %s258_s2 = int_to_ptr.vmem [resolvable:$true] %s257_s2 }
  0x2a   :  { %v271_v21 = vld [vmem:[%s486_s4] ss:$0 sm:$0xff]  ;;  %s400_s12 = scalar_lea.vmem %s258_s2, 128  ;;  %p405_p2 = scmp.lt.s32.totalorder %s258_s2, %s258_s2 }
  0x2b   :  { %p401_p1 = scmp.ne.s32.totalorder %s258_s2, %s400_s12  ;;  %p406_p3 = scmp.lt.s32.totalorder %s400_s12, %s400_s12 }
  0x2c   :  { %295 = vmatpush3.bf16.msra.mxu0 %v329_v2  ;;  %303 = vmatpush3.bf16.msra.mxu1 %v331_v6 }
  0x2d   :  { %304 = vmatprep.subr.bf16.mxu1 %v431_v0  ;;  %p407_p4 = por %p406_p3, %p405_p2 }
  0x2f   :  { %297 = vmatmul.mubr.msk.bf16.vlgmr.msra.gmra.mxu0 %vm90_vm1, %v66_v5  ;;  %p408_p5 = pnand %p407_p4, %p401_p1 }
  0x30   :  { %305 = vmatpush3.bf16.msra.mxu1 %v332_v7 }
  0x31   :  { %306 = vmatprep.subr.bf16.mxu1 %v431_v0 }
  0x34   :  { %307 = vmatpush3.bf16.msra.mxu1 %v333_v8 }
  0x35   :  { %308 = vmatprep.subr.bf16.mxu1 %v431_v0 }
  0x38   :  { %309 = vmatpush3.bf16.msra.mxu1 %v334_v9 }
  0x39   :  { %310 = vmatprep.subr.bf16.mxu1 %v431_v0 }
  0x3c   :  { %311 = vmatpush3.bf16.msra.mxu1 %v335_v10 }
  0x3d   :  { %312 = vmatprep.subr.bf16.mxu1 %v431_v0 }
  0x40   :  { %313 = vmatpush3.bf16.msra.mxu1 %v336_v11 }
  0x41   :  { %314 = vmatprep.subr.bf16.mxu1 %v431_v0 }
  0x44   :  { %315 = vmatpush3.bf16.msra.mxu1 %v337_v12 }
  0xef   :  { %v128_v14 = vpop.f32.mrf.mxu0 }
  0xf0   :  { %v129_v15 = vadd.f32 %v267_v13, %v128_v14 }
  0xf1   :  { %v298_v16 = vpop.f32.mrf.mxu0 }
  0xf2   :  { %v134_v17 = vmax.f32 %v129_v15, 0.0 }
  0xf3   :  { %v131_v18 = vpop.f32.mrf.mxu0 }
  0xf4   :  { %v137_v19 = vpack.c.bf16 %v134_v17, %v134_v17 }
  0xf5   :  { %v299_v20 = vpop.f32.mrf.mxu0 }
  0xf6   :  { %317 = vmatmul.mubr.bf16.vlgmr.msra.gmra.mxu1 %v137_v19 }
 0x1b6   :  { %v243_v22 = vpop.f32.mrf.mxu1 }
 0x1b7   :  { %v244_v23 = vadd.f32 %v271_v21, %v243_v22 }
 0x1b8   :  { %v318_v24 = vpop.f32.mrf.mxu1 }
 0x1b9   :  { %338 = vtanh.f32 %v244_v23 }
 0x1ba   :  { %v246_v25 = vpop.f32.mrf.mxu1 }
 0x1bc   :  { %v319_v26 = vpop.f32.mrf.mxu1 }
 0x1c6   :  { %v339_v27 = vpop.eup %338 }
 0x1c7   :  { %250 = vst [vmem:[#allocation9] sm:$0xff] %v339_v27 }
 0x1c8   :  { %411 = shalt.err (!%p408_p5)
}
 0x1c9   :  { %260 = dma.vmem_to_hbm [thread:$0]  %s258_s2, 128, %s487_s5, [#allocation5]  }
 0x1ca   :  { %424 = dma.done.wait [#allocation5], 128  }
 0x1cb   :  { %425 = vsyncadd [#allocation5], 4294967168 }
 0x1cc   :  { %264 = vsyncpa [#allocation4], 1 }
 0x1cd   :  { %265 = vsyncpa [#allocation7], 1 }
 0x1ce   :  { %266 = vsyncpa [#allocation5], 1 }

// kernel: tpu_custom_call.1
= control target key start
LH: loop header
LB: loop body
LE: loop exit
PB: predicated region body
PF: predicated region fallthrough
CT: control target
= control target key end

     0   :  { %10 = vsyncpa [#allocation4], 0  ;;  %s482_s0 = inlined_call_operand.hbm [shape: f32[8,32], index: 0, kind: input, shape index: {}]   ;;  %s483_s1 = inlined_call_operand.hbm [shape: bf16[32,128], index: 1, kind: input, shape index: {}]   ;;  %s484_s2 = inlined_call_operand.vmem [shape: f32[1,128], index: 2, kind: input, shape index: {}]   ;;  %s485_s3 = inlined_call_operand.hbm [shape: bf16[128,128], index: 3, kind: input, shape index: {}]   ;;  %s486_s4 = inlined_call_operand.vmem [shape: f32[1,128], index: 4, kind: input, shape index: {}]   ;;  %s487_s5 = inlined_call_operand.hbm [shape: f32[8,128], index: 5, kind: output, shape index: {}]  }
   0x1   :  { %11 = vsyncpa [#allocation7], 0 }
   0x2   :  { %12 = vsyncpa [#allocation5], 0  ;;  %s426_s18 = smov [#allocation6]  }
   0x3   :  { %s28_s19 = sshll.u32 %s426_s18, 4  ;;  %s29_s19 = int_to_ptr.vmem [resolvable:$true] %s28_s19 }
   0x4   :  { %s348_s20 = scalar_lea.vmem %s29_s19, 256  ;;  %p353_p1 = scmp.lt.s32.totalorder %s29_s19, %s29_s19 }
   0x5   :  { %p349_p0 = scmp.ne.s32.totalorder %s29_s19, %s348_s20  ;;  %p354_p2 = scmp.lt.s32.totalorder %s348_s20, %s348_s20 }
   0x7   :  { %p355_p3 = por %p354_p2, %p353_p1 }
   0x9   :  { %p356_p4 = pnand %p355_p3, %p349_p0 }
   0xb   :  { %359 = shalt.err (!%p356_p4)
}
   0xc   :  { %s427_s21 = smov 64   ;;  %s428_s22 = smov 4  }
   0xd   :  { %34 = dma.hbm_to_vmem [thread:$0]  %s483_s1, 256, %s29_s19, [#allocation7], %s427_s21, %s427_s21, %s428_s22  }
   0xe   :  { %s429_s25 = smov [#allocation3]   ;;  %s430_s27 = smov [#allocation8]  }
   0xf   :  { %s19_s26 = sshll.u32 %s429_s25, 4  ;;  %s42_s28 = sshll.u32 %s430_s27, 4  ;;  %s20_s26 = int_to_ptr.vmem [resolvable:$true] %s19_s26  ;;  %s43_s28 = int_to_ptr.vmem [resolvable:$true] %s42_s28 }
  0x10   :  { %s368_s29 = scalar_lea.vmem %s20_s26, 128  ;;  %p373_p6 = scmp.lt.s32.totalorder %s20_s26, %s20_s26 }
  0x11   :  { %p369_p5 = scmp.ne.s32.totalorder %s20_s26, %s368_s29  ;;  %p374_p7 = scmp.lt.s32.totalorder %s368_s29, %s368_s29 }
  0x13   :  { %p375_p8 = por %p374_p7, %p373_p6 }
  0x15   :  { %p376_p9 = pnand %p375_p8, %p369_p5 }
  0x17   :  { %379 = shalt.err (!%p376_p9)
}
  0x18   :  { %22 = dma.hbm_to_vmem [thread:$0]  %s482_s0, 128, %s20_s26, [#allocation4]  }
  0x19   :  { %s388_s7 = scalar_lea.vmem %s43_s28, 1024  ;;  %p393_p11 = scmp.lt.s32.totalorder %s43_s28, %s43_s28 }
  0x1a   :  { %p389_p10 = scmp.ne.s32.totalorder %s43_s28, %s388_s7  ;;  %p394_p12 = scmp.lt.s32.totalorder %s388_s7, %s388_s7 }
  0x1c   :  { %p395_p13 = por %p394_p12, %p393_p11 }
  0x1e   :  { %p396_p0 = pnand %p395_p13, %p389_p10 }
  0x20   :  { %399 = shalt.err (!%p396_p0)
}
  0x21   :  { %48 = dma.hbm_to_vmem [thread:$0]  %s485_s3, 1024, %s43_s28, [#allocation7], %s427_s21, %s427_s21, %s428_s22  }
  0x22   :  { %420 = dma.done.wait [#allocation4], 128  }
  0x23   :  { %421 = vsyncadd [#allocation4], 4294967168 }
  0x24   :  { %422 = dma.done.wait [#allocation7], 1280  }
  0x25   :  { %423 = vsyncadd [#allocation7], 4294966016  ;;  %v431_v0 = vmov 0.0   ;;  %vm432_vm0 = vmmov 0   ;;  %v328_v1 = vld [vmem:[#allocation6 + $0x8] sm:$0xff]   ;;  %v329_v2 = vld [vmem:[#allocation6] sm:$0xff]  }
  0x26   :  { %292 = vmatprep.subr.bf16.mxu0 %v431_v0  ;;  %296 = vmatprep.mubr.msk.bf16.mxu0 %vm432_vm0, %v431_v0  ;;  %v65_v3 = vld [vmem:[#allocation3] sm:$0xff]  ;;  %v330_v4 = vld [vmem:[#allocation8 + $0x38] sm:$0xff]   ;;  %v331_v6 = vld [vmem:[#allocation8 + $0x30] sm:$0xff]   ;;  %vm90_vm1 = vcmask 261120   ;;  %s433_s11 = smov [#allocation9]  }
  0x27   :  { %300 = vmatprep.subr.bf16.mxu1 %v431_v0  ;;  %316 = vmatprep.mubr.msk.bf16.mxu1 %vm432_vm0, %v431_v0  ;;  %v66_v5 = vpack.c.bf16 %v65_v3, %v65_v3  ;;  %v332_v7 = vld [vmem:[#allocation8 + $0x28] sm:$0xff]   ;;  %v333_v8 = vld [vmem:[#allocation8 + $0x20] sm:$0xff]   ;;  %v334_v9 = vld [vmem:[#allocation8 + $0x18] sm:$0xff]  }
  0x28   :  { %293 = vmatpush3.bf16.msra.mxu0 %v328_v1  ;;  %301 = vmatpush3.bf16.msra.mxu1 %v330_v4  ;;  %v335_v10 = vld [vmem:[#allocation8 + $0x10] sm:$0xff]   ;;  %v336_v11 = vld [vmem:[#allocation8 + $0x8] sm:$0xff]   ;;  %v337_v12 = vld [vmem:[#allocation8] sm:$0xff]  }
  0x29   :  { %294 = vmatprep.subr.bf16.mxu0 %v431_v0  ;;  %302 = vmatprep.subr.bf16.mxu1 %v431_v0  ;;  %v267_v13 = vld [vmem:[%s484_s2] ss:$0 sm:$0xff]  ;;  %s257_s2 = sshll.u32 %s433_s11, 4  ;;  %s258_s2 = int_to_ptr.vmem [resolvable:$true] %s257_s2 }
  0x2a   :  { %v271_v21 = vld [vmem:[%s486_s4] ss:$0 sm:$0xff]  ;;  %s400_s12 = scalar_lea.vmem %s258_s2, 128  ;;  %p405_p2 = scmp.lt.s32.totalorder %s258_s2, %s258_s2 }
  0x2b   :  { %p401_p1 = scmp.ne.s32.totalorder %s258_s2, %s400_s12  ;;  %p406_p3 = scmp.lt.s32.totalorder %s400_s12, %s400_s12 }
  0x2c   :  { %295 = vmatpush3.bf16.msra.mxu0 %v329_v2  ;;  %303 = vmatpush3.bf16.msra.mxu1 %v331_v6 }
  0x2d   :  { %304 = vmatprep.subr.bf16.mxu1 %v431_v0  ;;  %p407_p4 = por %p406_p3, %p405_p2 }
  0x2f   :  { %297 = vmatmul.mubr.msk.bf16.vlgmr.msra.gmra.mxu0 %vm90_vm1, %v66_v5  ;;  %p408_p5 = pnand %p407_p4, %p401_p1 }
  0x30   :  { %305 = vmatpush3.bf16.msra.mxu1 %v332_v7 }
  0x31   :  { %306 = vmatprep.subr.bf16.mxu1 %v431_v0 }
  0x34   :  { %307 = vmatpush3.bf16.msra.mxu1 %v333_v8 }
  0x35   :  { %308 = vmatprep.subr.bf16.mxu1 %v431_v0 }
  0x38   :  { %309 = vmatpush3.bf16.msra.mxu1 %v334_v9 }
  0x39   :  { %310 = vmatprep.subr.bf16.mxu1 %v431_v0 }
  0x3c   :  { %311 = vmatpush3.bf16.msra.mxu1 %v335_v10 }
  0x3d   :  { %312 = vmatprep.subr.bf16.mxu1 %v431_v0 }
  0x40   :  { %313 = vmatpush3.bf16.msra.mxu1 %v336_v11 }
  0x41   :  { %314 = vmatprep.subr.bf16.mxu1 %v431_v0 }
  0x44   :  { %315 = vmatpush3.bf16.msra.mxu1 %v337_v12 }
  0xef   :  { %v128_v14 = vpop.f32.mrf.mxu0 }
  0xf0   :  { %v129_v15 = vadd.f32 %v267_v13, %v128_v14 }
  0xf1   :  { %v298_v16 = vpop.f32.mrf.mxu0 }
  0xf2   :  { %v134_v17 = vmax.f32 %v129_v15, 0.0 }
  0xf3   :  { %v131_v18 = vpop.f32.mrf.mxu0 }
  0xf4   :  { %v137_v19 = vpack.c.bf16 %v134_v17, %v134_v17 }
  0xf5   :  { %v299_v20 = vpop.f32.mrf.mxu0 }
  0xf6   :  { %317 = vmatmul.mubr.bf16.vlgmr.msra.gmra.mxu1 %v137_v19 }
 0x1b6   :  { %v243_v22 = vpop.f32.mrf.mxu1 }
 0x1b7   :  { %v244_v23 = vadd.f32 %v271_v21, %v243_v22 }
 0x1b8   :  { %v318_v24 = vpop.f32.mrf.mxu1 }
 0x1b9   :  { %338 = vtanh.f32 %v244_v23 }
 0x1ba   :  { %v246_v25 = vpop.f32.mrf.mxu1 }
 0x1bc   :  { %v319_v26 = vpop.f32.mrf.mxu1 }
 0x1c6   :  { %v339_v27 = vpop.eup %338 }
 0x1c7   :  { %250 = vst [vmem:[#allocation9] sm:$0xff] %v339_v27 }
 0x1c8   :  { %411 = shalt.err (!%p408_p5)
}
 0x1c9   :  { %260 = dma.vmem_to_hbm [thread:$0]  %s258_s2, 128, %s487_s5, [#allocation5]  }
 0x1ca   :  { %424 = dma.done.wait [#allocation5], 128  }
 0x1cb   :  { %425 = vsyncadd [#allocation5], 4294967168 }
 0x1cc   :  { %264 = vsyncpa [#allocation4], 1 }
 0x1cd   :  { %265 = vsyncpa [#allocation7], 1 }
 0x1ce   :  { %266 = vsyncpa [#allocation5], 1 }

</bundles_post_ra>
